<compile_context>
chip_gen: v7x
topology: tpu7x:2x2x1
jax: 0.10.0
libtpu: 0.0.40
codegen_flags: <defaults>
</compile_context>

<pallas_src>
import jax
import jax.numpy as jnp
from jax.experimental import pallas as pl
from jax.experimental.pallas import tpu as pltpu


def _attn_decoder_kernel(xh_ref, c_prev_ref, enc_ref,
                         w_gates_ref, b_gates_ref,
                         w_concat_ref, b_concat_ref,
                         w_out_ref, b_out_ref,
                         logp_ref, ctx_ref, hn_ref, cn_ref, attn_ref):
    """Whole AttnDecoderRNN forward for one decoding step (no grid)."""
    H = c_prev_ref.shape[1]

    # ---- LSTM cell (single step): one stacked MXU push --------------------
    # gates: (B, 4H) in PyTorch gate order [i, f, g, o]
    gates = (jnp.dot(xh_ref[...], w_gates_ref[...],
                     preferred_element_type=jnp.float32)
             + b_gates_ref[...])

    s = jax.nn.sigmoid(gates)        # full-vreg sigmoid (B, 4H)
    th = jnp.tanh(gates)             # full-vreg tanh    (B, 4H)
    i_g = s[:, 0 * H:1 * H]
    f_g = s[:, 1 * H:2 * H]
    g_g = th[:, 2 * H:3 * H]
    o_g = s[:, 3 * H:4 * H]

    c_prev = c_prev_ref[...]
    c_new = f_g * c_prev + i_g * g_g
    h_new = o_g * jnp.tanh(c_new)                      # == rnn_output.squeeze(0)

    # ---- dot-attention over encoder outputs -------------------------------
    enc = enc_ref[...]                                 # (B, T, H)
    e = jnp.sum(enc * h_new[:, None, :], axis=-1)      # (B, T) energies
    e_max = jnp.max(e, axis=-1, keepdims=True)
    p = jnp.exp(e - e_max)
    attn = p / jnp.sum(p, axis=-1, keepdims=True)      # softmax over T
    context = jnp.sum(attn[:, :, None] * enc, axis=1)  # (B, H)

    # ---- concat layer: tanh(Linear([h_new, context])) ---------------------
    # W_concat^T is (2H, H); split it so no in-kernel lane concat is needed.
    wc = w_concat_ref[...]
    concat_out = jnp.tanh(
        jnp.dot(h_new, wc[:H, :], preferred_element_type=jnp.float32)
        + jnp.dot(context, wc[H:, :], preferred_element_type=jnp.float32)
        + b_concat_ref[...])

    # ---- output projection + log_softmax (lane-dense, V multiple of 128) --
    logits = (jnp.dot(concat_out, w_out_ref[...],
                      preferred_element_type=jnp.float32)
              + b_out_ref[...])
    z = logits - jnp.max(logits, axis=-1, keepdims=True)
    logp = z - jnp.log(jnp.sum(jnp.exp(z), axis=-1, keepdims=True))

    logp_ref[...] = logp
    ctx_ref[...] = context
    hn_ref[...] = h_new
    cn_ref[...] = c_new
    attn_ref[...] = attn


def attn_decoder_forward(input_seq, last_hidden, encoder_outputs, params):
    """
    input_seq:        (B,) int32 token ids (one decoding step)
    last_hidden:      (h_0, c_0), each (1, B, H) float32
    encoder_outputs:  (T, B, H) float32
    params: dict with
        embedding (V, E), w_ih (4H, E), w_hh (4H, H), b_ih (4H,), b_hh (4H,),
        w_concat (H, 2H), b_concat (H,), w_out (V, H), b_out (V,)
    Returns: (log_probs (B, V), context (B, H),
              hidden = (h_n (1, B, H), c_n (1, B, H)),
              attn_weights (B, 1, T))
    """
    h0, c0 = last_hidden
    B = input_seq.shape[0]
    T = encoder_outputs.shape[0]
    H = h0.shape[-1]
    V = params["w_out"].shape[0]

    # --- plain-JAX glue (gather, transposes, weight stacking) --------------
    embedded = jnp.take(params["embedding"], input_seq, axis=0)   # (B, E)
    # dropout: identity in eval mode.
    h_prev = h0[0]                                                 # (B, H)
    c_prev = c0[0]                                                 # (B, H)

    # Fused LSTM operand: one matmul of [x, h] against stacked weights.
    xh = jnp.concatenate([embedded, h_prev], axis=1)               # (B, E+H)
    w_gates = jnp.concatenate(
        [jnp.transpose(params["w_ih"]), jnp.transpose(params["w_hh"])],
        axis=0)                                                    # (E+H, 4H)
    b_gates = (params["b_ih"] + params["b_hh"])[None, :]           # (1, 4H)

    enc_bth = jnp.transpose(encoder_outputs, (1, 0, 2))            # (B, T, H)

    w_concat_t = jnp.transpose(params["w_concat"])                 # (2H, H)
    b_concat = params["b_concat"][None, :]                         # (1, H)
    w_out_t = jnp.transpose(params["w_out"])                       # (H, V)
    b_out = params["b_out"][None, :]                               # (1, V)

    vmem = pl.BlockSpec(memory_space=pltpu.MemorySpace.VMEM)

    logp, context, h_n, c_n, attn = pl.pallas_call(
        _attn_decoder_kernel,
        out_shape=(
            jax.ShapeDtypeStruct((B, V), jnp.float32),   # log_softmax output
            jax.ShapeDtypeStruct((B, H), jnp.float32),   # context
            jax.ShapeDtypeStruct((B, H), jnp.float32),   # h_n
            jax.ShapeDtypeStruct((B, H), jnp.float32),   # c_n
            jax.ShapeDtypeStruct((B, T), jnp.float32),   # attention weights
        ),
        in_specs=[vmem] * 9,
        out_specs=(vmem,) * 5,
    )(xh, c_prev, enc_bth, w_gates, b_gates, w_concat_t, b_concat, w_out_t, b_out)

    hidden = (h_n[None, :, :], c_n[None, :, :])
    attn_weights = attn[:, None, :]                                # (B, 1, T)
    return logp, context, hidden, attn_weights


def _reference_forward(input_seq, last_hidden, encoder_outputs, params):
    """Pure-JAX reference mirroring the PyTorch AttnDecoderRNN ('dot' attn)."""
    h, c = last_hidden[0][0], last_hidden[1][0]
    H = h.shape[-1]
    x = jnp.take(params["embedding"], input_seq, axis=0)
    gates = (x @ params["w_ih"].T + h @ params["w_hh"].T
             + params["b_ih"] + params["b_hh"])
    i = jax.nn.sigmoid(gates[:, :H])
    f = jax.nn.sigmoid(gates[:, H:2 * H])
    g = jnp.tanh(gates[:, 2 * H:3 * H])
    o = jax.nn.sigmoid(gates[:, 3 * H:])
    c_new = f * c + i * g
    h_new = o * jnp.tanh(c_new)

    e = jnp.einsum("tbh,bh->bt", encoder_outputs, h_new)
    attn = jax.nn.softmax(e, axis=-1)
    context = jnp.einsum("bt,tbh->bh", attn, encoder_outputs)

    concat_in = jnp.concatenate([h_new, context], axis=1)
    concat_out = jnp.tanh(concat_in @ params["w_concat"].T + params["b_concat"])
    logits = concat_out @ params["w_out"].T + params["b_out"]
    logp = jax.nn.log_softmax(logits, axis=-1)
    return logp, context, (h_new[None], c_new[None]), attn[:, None, :]


if __name__ == "__main__":
    # Small shapes consistent with the module's forward.
    V = 128     # output_size (vocab)  -> lane-dense log-softmax output
    E = 64      # embedding_size
    H = 32      # hidden_size          -> gate dim 4H = 128 (lane-aligned)
    T = 8       # encoder sequence length
    B = 8       # batch

    key = jax.random.PRNGKey(0)
    (k_emb, k_ids, k_wih, k_whh, k_bih, k_bhh,
     k_wc, k_bc, k_wo, k_bo, k_h0, k_c0, k_enc) = jax.random.split(key, 13)

    params = {
        "embedding": jax.random.normal(k_emb, (V, E), jnp.float32) * 0.1,
        "w_ih": jax.random.normal(k_wih, (4 * H, E), jnp.float32) * 0.1,
        "w_hh": jax.random.normal(k_whh, (4 * H, H), jnp.float32) * 0.1,
        "b_ih": jax.random.normal(k_bih, (4 * H,), jnp.float32) * 0.1,
        "b_hh": jax.random.normal(k_bhh, (4 * H,), jnp.float32) * 0.1,
        "w_concat": jax.random.normal(k_wc, (H, 2 * H), jnp.float32) * 0.1,
        "b_concat": jax.random.normal(k_bc, (H,), jnp.float32) * 0.1,
        "w_out": jax.random.normal(k_wo, (V, H), jnp.float32) * 0.1,
        "b_out": jax.random.normal(k_bo, (V,), jnp.float32) * 0.1,
    }

    input_seq = jax.random.randint(k_ids, (B,), 0, V, dtype=jnp.int32)
    last_hidden = (jax.random.normal(k_h0, (1, B, H), jnp.float32) * 0.5,
                   jax.random.normal(k_c0, (1, B, H), jnp.float32) * 0.5)
    encoder_outputs = jax.random.normal(k_enc, (T, B, H), jnp.float32) * 0.5

    logp, context, hidden, attn_w = attn_decoder_forward(
        input_seq, last_hidden, encoder_outputs, params)
    jax.block_until_ready(logp)

    r_logp, r_ctx, r_hidden, r_attn = _reference_forward(
        input_seq, last_hidden, encoder_outputs, params)

    assert logp.shape == (B, V)
    assert context.shape == (B, H)
    assert hidden[0].shape == (1, B, H) and hidden[1].shape == (1, B, H)
    assert attn_w.shape == (B, 1, T)

    assert jnp.allclose(logp, r_logp, atol=1e-4, rtol=1e-4), "log_softmax mismatch"
    assert jnp.allclose(context, r_ctx, atol=1e-4, rtol=1e-4), "context mismatch"
    assert jnp.allclose(hidden[0], r_hidden[0], atol=1e-4, rtol=1e-4), "h_n mismatch"
    assert jnp.allclose(hidden[1], r_hidden[1], atol=1e-4, rtol=1e-4), "c_n mismatch"
    assert jnp.allclose(attn_w, r_attn, atol=1e-4, rtol=1e-4), "attn mismatch"

    print("KERNEL_OK")
</pallas_src>

<mosaic_0001>
module attributes {stable_mosaic.version = 11 : i64} {
  func.func @_attn_decoder_kernel(%arg0: memref<8x96xf32, #tpu.memory_space<vmem>>, %arg1: memref<8x32xf32, #tpu.memory_space<vmem>>, %arg2: memref<8x8x32xf32, #tpu.memory_space<vmem>>, %arg3: memref<96x128xf32, #tpu.memory_space<vmem>>, %arg4: memref<1x128xf32, #tpu.memory_space<vmem>>, %arg5: memref<64x32xf32, #tpu.memory_space<vmem>>, %arg6: memref<1x32xf32, #tpu.memory_space<vmem>>, %arg7: memref<32x128xf32, #tpu.memory_space<vmem>>, %arg8: memref<1x128xf32, #tpu.memory_space<vmem>>, %arg9: memref<8x128xf32, #tpu.memory_space<vmem>>, %arg10: memref<8x32xf32, #tpu.memory_space<vmem>>, %arg11: memref<8x32xf32, #tpu.memory_space<vmem>>, %arg12: memref<8x32xf32, #tpu.memory_space<vmem>>, %arg13: memref<8x8xf32, #tpu.memory_space<vmem>>) attributes {dimension_semantics = [], scalar_prefetch = 0 : i64, scratch_operands = 0 : i64, tpu.core_type = #tpu.core_type<tc>} {
    %c0 = arith.constant 0 : index
    %c0_0 = arith.constant 0 : index
    %0 = vector.load %arg0[%c0, %c0_0] : memref<8x96xf32, #tpu.memory_space<vmem>>, vector<8x96xf32>
    %c0_1 = arith.constant 0 : index
    %c0_2 = arith.constant 0 : index
    %1 = vector.load %arg3[%c0_1, %c0_2] : memref<96x128xf32, #tpu.memory_space<vmem>>, vector<96x128xf32>
    %cst = arith.constant dense<0.000000e+00> : vector<8x128xf32>
    %2 = tpu.matmul %0, %1, %cst {dimension_numbers = #tpu.dot_dimension_numbers<[1], [0], [0], [1], [0, 0, 1, 1], [], []>} : vector<8x96xf32>, vector<96x128xf32>, vector<8x128xf32> -> vector<8x128xf32>
    %c0_3 = arith.constant 0 : index
    %c0_4 = arith.constant 0 : index
    %3 = vector.load %arg4[%c0_3, %c0_4] : memref<1x128xf32, #tpu.memory_space<vmem>>, vector<1x128xf32>
    %4 = vector.broadcast %3 : vector<1x128xf32> to vector<8x128xf32>
    %5 = arith.addf %2, %4 : vector<8x128xf32>
    %6 = arith.negf %5 : vector<8x128xf32>
    %7 = math.exp %6 : vector<8x128xf32>
    %cst_5 = arith.constant 1.000000e+00 : f32
    %8 = vector.broadcast %cst_5 : f32 to vector<8x128xf32>
    %9 = arith.addf %8, %7 : vector<8x128xf32>
    %10 = arith.divf %8, %9 : vector<8x128xf32>
    %11 = math.tanh %5 : vector<8x128xf32>
    %12 = vector.extract_strided_slice %10 {offsets = [0, 0], sizes = [8, 32], strides = [1, 1]} : vector<8x128xf32> to vector<8x32xf32>
    %13 = vector.extract_strided_slice %10 {offsets = [0, 32], sizes = [8, 32], strides = [1, 1]} : vector<8x128xf32> to vector<8x32xf32>
    %14 = vector.extract_strided_slice %11 {offsets = [0, 64], sizes = [8, 32], strides = [1, 1]} : vector<8x128xf32> to vector<8x32xf32>
    %15 = vector.extract_strided_slice %10 {offsets = [0, 96], sizes = [8, 32], strides = [1, 1]} : vector<8x128xf32> to vector<8x32xf32>
    %c0_6 = arith.constant 0 : index
    %c0_7 = arith.constant 0 : index
    %16 = vector.load %arg1[%c0_6, %c0_7] : memref<8x32xf32, #tpu.memory_space<vmem>>, vector<8x32xf32>
    %17 = arith.mulf %13, %16 : vector<8x32xf32>
    %18 = arith.mulf %12, %14 : vector<8x32xf32>
    %19 = arith.addf %17, %18 : vector<8x32xf32>
    %20 = math.tanh %19 : vector<8x32xf32>
    %21 = arith.mulf %15, %20 : vector<8x32xf32>
    %c0_8 = arith.constant 0 : index
    %c0_9 = arith.constant 0 : index
    %c0_10 = arith.constant 0 : index
    %22 = vector.load %arg2[%c0_8, %c0_9, %c0_10] : memref<8x8x32xf32, #tpu.memory_space<vmem>>, vector<8x8x32xf32>
    %23 = vector.shape_cast %21 : vector<8x32xf32> to vector<8x1x32xf32>
    %24 = vector.broadcast %23 : vector<8x1x32xf32> to vector<8x8x32xf32>
    %25 = arith.mulf %22, %24 : vector<8x8x32xf32>
    %cst_11 = arith.constant dense<0.000000e+00> : vector<8x8xf32>
    %26 = vector.multi_reduction <add>, %25, %cst_11 [2] : vector<8x8x32xf32> to vector<8x8xf32>
    %cst_12 = arith.constant dense<0xFF800000> : vector<8xf32>
    %27 = vector.multi_reduction <maximumf>, %26, %cst_12 [1] : vector<8x8xf32> to vector<8xf32>
    %28 = vector.shape_cast %27 : vector<8xf32> to vector<8x1xf32>
    %29 = vector.broadcast %28 : vector<8x1xf32> to vector<8x8xf32>
    %30 = arith.subf %26, %29 : vector<8x8xf32>
    %31 = math.exp %30 : vector<8x8xf32>
    %cst_13 = arith.constant dense<0.000000e+00> : vector<8xf32>
    %32 = vector.multi_reduction <add>, %31, %cst_13 [1] : vector<8x8xf32> to vector<8xf32>
    %33 = vector.shape_cast %32 : vector<8xf32> to vector<8x1xf32>
    %34 = vector.broadcast %33 : vector<8x1xf32> to vector<8x8xf32>
    %35 = arith.divf %31, %34 : vector<8x8xf32>
    %36 = vector.shape_cast %35 : vector<8x8xf32> to vector<8x8x1xf32>
    %37 = vector.broadcast %36 : vector<8x8x1xf32> to vector<8x8x32xf32>
    %38 = arith.mulf %37, %22 : vector<8x8x32xf32>
    %cst_14 = arith.constant dense<0.000000e+00> : vector<8x32xf32>
    %39 = vector.multi_reduction <add>, %38, %cst_14 [1] : vector<8x8x32xf32> to vector<8x32xf32>
    %c0_15 = arith.constant 0 : index
    %c0_16 = arith.constant 0 : index
    %40 = vector.load %arg5[%c0_15, %c0_16] : memref<64x32xf32, #tpu.memory_space<vmem>>, vector<64x32xf32>
    %41 = vector.extract_strided_slice %40 {offsets = [0, 0], sizes = [32, 32], strides = [1, 1]} : vector<64x32xf32> to vector<32x32xf32>
    %cst_17 = arith.constant dense<0.000000e+00> : vector<8x32xf32>
    %42 = tpu.matmul %21, %41, %cst_17 {dimension_numbers = #tpu.dot_dimension_numbers<[1], [0], [0], [1], [0, 0, 1, 1], [], []>} : vector<8x32xf32>, vector<32x32xf32>, vector<8x32xf32> -> vector<8x32xf32>
    %43 = vector.extract_strided_slice %40 {offsets = [32, 0], sizes = [32, 32], strides = [1, 1]} : vector<64x32xf32> to vector<32x32xf32>
    %cst_18 = arith.constant dense<0.000000e+00> : vector<8x32xf32>
    %44 = tpu.matmul %39, %43, %cst_18 {dimension_numbers = #tpu.dot_dimension_numbers<[1], [0], [0], [1], [0, 0, 1, 1], [], []>} : vector<8x32xf32>, vector<32x32xf32>, vector<8x32xf32> -> vector<8x32xf32>
    %45 = arith.addf %42, %44 : vector<8x32xf32>
    %c0_19 = arith.constant 0 : index
    %c0_20 = arith.constant 0 : index
    %46 = vector.load %arg6[%c0_19, %c0_20] : memref<1x32xf32, #tpu.memory_space<vmem>>, vector<1x32xf32>
    %47 = vector.broadcast %46 : vector<1x32xf32> to vector<8x32xf32>
    %48 = arith.addf %45, %47 : vector<8x32xf32>
    %49 = math.tanh %48 : vector<8x32xf32>
    %c0_21 = arith.constant 0 : index
    %c0_22 = arith.constant 0 : index
    %50 = vector.load %arg7[%c0_21, %c0_22] : memref<32x128xf32, #tpu.memory_space<vmem>>, vector<32x128xf32>
    %cst_23 = arith.constant dense<0.000000e+00> : vector<8x128xf32>
    %51 = tpu.matmul %49, %50, %cst_23 {dimension_numbers = #tpu.dot_dimension_numbers<[1], [0], [0], [1], [0, 0, 1, 1], [], []>} : vector<8x32xf32>, vector<32x128xf32>, vector<8x128xf32> -> vector<8x128xf32>
    %c0_24 = arith.constant 0 : index
    %c0_25 = arith.constant 0 : index
    %52 = vector.load %arg8[%c0_24, %c0_25] : memref<1x128xf32, #tpu.memory_space<vmem>>, vector<1x128xf32>
    %53 = vector.broadcast %52 : vector<1x128xf32> to vector<8x128xf32>
    %54 = arith.addf %51, %53 : vector<8x128xf32>
    %cst_26 = arith.constant dense<0xFF800000> : vector<8xf32>
    %55 = vector.multi_reduction <maximumf>, %54, %cst_26 [1] : vector<8x128xf32> to vector<8xf32>
    %56 = vector.shape_cast %55 : vector<8xf32> to vector<8x1xf32>
    %57 = vector.broadcast %56 : vector<8x1xf32> to vector<8x128xf32>
    %58 = arith.subf %54, %57 : vector<8x128xf32>
    %59 = math.exp %58 : vector<8x128xf32>
    %cst_27 = arith.constant dense<0.000000e+00> : vector<8xf32>
    %60 = vector.multi_reduction <add>, %59, %cst_27 [1] : vector<8x128xf32> to vector<8xf32>
    %61 = vector.shape_cast %60 : vector<8xf32> to vector<8x1xf32>
    %62 = math.log %61 : vector<8x1xf32>
    %63 = vector.broadcast %62 : vector<8x1xf32> to vector<8x128xf32>
    %64 = arith.subf %58, %63 : vector<8x128xf32>
    %c0_28 = arith.constant 0 : index
    %c0_29 = arith.constant 0 : index
    %65 = vector.load %arg9[%c0_28, %c0_29] : memref<8x128xf32, #tpu.memory_space<vmem>>, vector<8x128xf32>
    tpu.vector_store %arg9[%c0_28, %c0_29], %64 {strides = array<i32>} : memref<8x128xf32, #tpu.memory_space<vmem>>, vector<8x128xf32>,
    %c0_30 = arith.constant 0 : index
    %c0_31 = arith.constant 0 : index
    %66 = vector.load %arg10[%c0_30, %c0_31] : memref<8x32xf32, #tpu.memory_space<vmem>>, vector<8x32xf32>
    tpu.vector_store %arg10[%c0_30, %c0_31], %39 {strides = array<i32>} : memref<8x32xf32, #tpu.memory_space<vmem>>, vector<8x32xf32>,
    %c0_32 = arith.constant 0 : index
    %c0_33 = arith.constant 0 : index
    %67 = vector.load %arg11[%c0_32, %c0_33] : memref<8x32xf32, #tpu.memory_space<vmem>>, vector<8x32xf32>
    tpu.vector_store %arg11[%c0_32, %c0_33], %21 {strides = array<i32>} : memref<8x32xf32, #tpu.memory_space<vmem>>, vector<8x32xf32>,
    %c0_34 = arith.constant 0 : index
    %c0_35 = arith.constant 0 : index
    %68 = vector.load %arg12[%c0_34, %c0_35] : memref<8x32xf32, #tpu.memory_space<vmem>>, vector<8x32xf32>
    tpu.vector_store %arg12[%c0_34, %c0_35], %19 {strides = array<i32>} : memref<8x32xf32, #tpu.memory_space<vmem>>, vector<8x32xf32>,
    %c0_36 = arith.constant 0 : index
    %c0_37 = arith.constant 0 : index
    %69 = vector.load %arg13[%c0_36, %c0_37] : memref<8x8xf32, #tpu.memory_space<vmem>>, vector<8x8xf32>
    tpu.vector_store %arg13[%c0_36, %c0_37], %35 {strides = array<i32>} : memref<8x8xf32, #tpu.memory_space<vmem>>, vector<8x8xf32>,
    return
  }
}

</mosaic_0001>

<bundles_post_ra>
// kernel: tpu_custom_call.1
= control target key start
LH: loop header
LB: loop body
LE: loop exit
PB: predicated region body
PF: predicated region fallthrough
CT: control target
= control target key end

     0   :  { %19 = vsyncpa [#allocation3], 0  ;;  %s1988_s0 = inlined_call_operand.vmem [shape: f32[8,96], index: 0, kind: input, shape index: {}]   ;;  %s1989_s1 = inlined_call_operand.hbm [shape: f32[8,32], index: 1, kind: input, shape index: {}]   ;;  %s1990_s2 = inlined_call_operand.hbm [shape: f32[8,8,32], index: 2, kind: input, shape index: {}]   ;;  %s1991_s3 = inlined_call_operand.vmem [shape: f32[96,128], index: 3, kind: input, shape index: {}]   ;;  %s1992_s4 = inlined_call_operand.vmem [shape: f32[1,128], index: 4, kind: input, shape index: {}]   ;;  %s1993_s5 = inlined_call_operand.vmem [shape: f32[64,32], index: 5, kind: input, shape index: {}]   ;;  %s1994_s6 = inlined_call_operand.vmem [shape: f32[1,32], index: 6, kind: input, shape index: {}]   ;;  %s1995_s7 = inlined_call_operand.hbm [shape: f32[32,128], index: 7, kind: input, shape index: {}]   ;;  %s1996_s8 = inlined_call_operand.vmem [shape: f32[1,128], index: 8, kind: input, shape index: {}]   ;;  %s1997_s9 = inlined_call_operand.hbm [shape: f32[8,128], index: 9, kind: output, shape index: {0}]   ;;  %s1998_s10 = inlined_call_operand.hbm [shape: f32[8,32], index: 10, kind: output, shape index: {1}]   ;;  %s1999_s11 = inlined_call_operand.hbm [shape: f32[8,32], index: 11, kind: output, shape index: {2}]   ;;  %s2000_s12 = inlined_call_operand.hbm [shape: f32[8,32], index: 12, kind: output, shape index: {3}]   ;;  %s2001_s13 = inlined_call_operand.hbm [shape: f32[8,8], index: 13, kind: output, shape index: {4}]  }
   0x1   :  { %20 = vsyncpa [#allocation6], 0 }
   0x2   :  { %21 = vsyncpa [#allocation4], 0 }
   0x3   :  { %22 = vsyncpa [#allocation10], 0 }
   0x4   :  { %23 = vsyncpa [#allocation13], 0  ;;  %s1488_s25 = smov [#allocation5]   ;;  %s1302_s29 = scalar_lea.hbm %s1990_s2, 1024 }
   0x5   :  { %s41_s26 = sshll.u32 %s1488_s25, 4  ;;  %p1303_p0 = scmp.ne.s32.totalorder %s1990_s2, %s1302_s29  ;;  %s42_s26 = int_to_ptr.vmem [resolvable:$true] %s41_s26 }
   0x6   :  { %p1306_p1 = scmp.lt.u32.totalorder %s1302_s29, %s1990_s2 }
   0x8   :  { %p1308_p2 = pnand %p1306_p1, %p1303_p0 }
   0xa   :  { %1311 = shalt.err (!%p1308_p2)
}
   0xb   :  { %s1312_s17 = scalar_lea.vmem %s42_s26, 1024  ;;  %p1317_p4 = scmp.lt.s32.totalorder %s42_s26, %s42_s26 }
   0xc   :  { %p1313_p3 = scmp.ne.s32.totalorder %s42_s26, %s1312_s17  ;;  %p1318_p5 = scmp.lt.s32.totalorder %s1312_s17, %s1312_s17 }
   0xe   :  { %p1319_p6 = por %p1318_p5, %p1317_p4 }
  0x10   :  { %p1320_p7 = pnand %p1319_p6, %p1313_p3 }
  0x12   :  { %1323 = shalt.err (!%p1320_p7)
}
  0x13   :  { %s1489_s18 = smov 128   ;;  %s1490_s19 = smov 8  }
  0x14   :  { %47 = dma.hbm_to_vmem [thread:$0]  %s1990_s2, 1024, %s42_s26, [#allocation6], %s1489_s18, %s1489_s18, %s1490_s19  }
  0x15   :  { %s1491_s22 = smov [#allocation2]   ;;  %s1492_s24 = smov [#allocation7]  }
  0x16   :  { %s32_s23 = sshll.u32 %s1491_s22, 4  ;;  %s61_s25 = sshll.u32 %s1492_s24, 4  ;;  %s33_s23 = int_to_ptr.vmem [resolvable:$true] %s32_s23  ;;  %s62_s25 = int_to_ptr.vmem [resolvable:$true] %s61_s25 }
  0x17   :  { %s1324_s29 = scalar_lea.hbm %s1989_s1, 128 }
  0x18   :  { %p1325_p8 = scmp.ne.s32.totalorder %s1989_s1, %s1324_s29  ;;  %p1328_p9 = scmp.lt.u32.totalorder %s1324_s29, %s1989_s1 }
  0x1a   :  { %p1330_p10 = pnand %p1328_p9, %p1325_p8 }
  0x1c   :  { %1333 = shalt.err (!%p1330_p10)
}
  0x1d   :  { %s1334_s2 = scalar_lea.vmem %s33_s23, 128  ;;  %p1339_p12 = scmp.lt.s32.totalorder %s33_s23, %s33_s23 }
  0x1e   :  { %p1335_p11 = scmp.ne.s32.totalorder %s33_s23, %s1334_s2  ;;  %p1340_p13 = scmp.lt.s32.totalorder %s1334_s2, %s1334_s2 }
  0x20   :  { %p1341_p0 = por %p1340_p13, %p1339_p12 }
  0x22   :  { %p1342_p1 = pnand %p1341_p0, %p1335_p11 }
  0x24   :  { %1345 = shalt.err (!%p1342_p1)
}
  0x25   :  { %35 = dma.hbm_to_vmem [thread:$0]  %s1989_s1, 128, %s33_s23, [#allocation3]  }
  0x26   :  { %s1346_s22 = scalar_lea.hbm %s1995_s7, 512 }
  0x27   :  { %p1347_p2 = scmp.ne.s32.totalorder %s1995_s7, %s1346_s22  ;;  %p1350_p3 = scmp.lt.u32.totalorder %s1346_s22, %s1995_s7 }
  0x29   :  { %p1352_p4 = pnand %p1350_p3, %p1347_p2 }
  0x2b   :  { %1355 = shalt.err (!%p1352_p4)
}
  0x2c   :  { %s1356_s30 = scalar_lea.vmem %s62_s25, 512  ;;  %p1361_p6 = scmp.lt.s32.totalorder %s62_s25, %s62_s25 }
  0x2d   :  { %p1357_p5 = scmp.ne.s32.totalorder %s62_s25, %s1356_s30  ;;  %p1362_p7 = scmp.lt.s32.totalorder %s1356_s30, %s1356_s30 }
  0x2f   :  { %p1363_p8 = por %p1362_p7, %p1361_p6 }
  0x31   :  { %p1364_p9 = pnand %p1363_p8, %p1357_p5 }
  0x33   :  { %1367 = shalt.err (!%p1364_p9)
}
  0x34   :  { %67 = dma.hbm_to_vmem [thread:$0]  %s1995_s7, 512, %s62_s25, [#allocation6], %s1489_s18, %s1489_s18, %s1490_s19  }
  0x35   :  { %1478 = dma.done.wait [#allocation3], 128  }
  0x36   :  { %1479 = vsyncadd [#allocation3], 4294967168 }
  0x37   :  { %1480 = dma.done.wait [#allocation6], 1536  }
  0x38   :  { %1481 = vsyncadd [#allocation6], 4294965760  ;;  %v1493_v0 = vmov 0.0|0.0   ;;  %vm1494_vm0 = vmmov 0   ;;  %v1495_v1 = vmov 0.0   ;;  %v80_v2 = vld [vmem:[%s1991_s3] sm:$0xff]  ;;  %v215_v40 = vlaneseq }
  0x39   :  { %1200 = vmatprep.subr.bf16.mxu0 %v1493_v0  ;;  %1164 = vmatprep.mubr.msk.f32.mxu0 %vm1494_vm0, %v1495_v1  ;;  %v81_v3 = vld [vmem:[%s1991_s3 + $0x8] sm:$0xff]  ;;  %v82_v4 = vld [vmem:[%s1991_s3 + $0x10] sm:$0xff]  ;;  %v83_v6 = vld [vmem:[%s1991_s3 + $0x18] sm:$0xff]  ;;  %vm99_vm1 = vcmask 785408   ;;  %s1497_s26 = smov 32   ;;  %vm324_vm2 = vcmask 261120  }
  0x3a   :  { %1218 = vmatprep.subr.bf16.mxu1 %v1493_v0  ;;  %1175 = vmatprep.mubr.msk.f32.mxu1 %vm1494_vm0, %v1495_v1  ;;  %v1201_v5 = vpack.c.bf16 %v81_v3, %v80_v2  ;;  %v1204_v7 = vpack.c.bf16 %v83_v6, %v82_v4  ;;  %v84_v8 = vld [vmem:[%s1991_s3 + $0x20] sm:$0xff]  ;;  %v85_v9 = vld [vmem:[%s1991_s3 + $0x28] sm:$0xff]  ;;  %v86_v11 = vld [vmem:[%s1991_s3 + $0x30] sm:$0xff]  ;;  %v1498_v38 = vmov 1966171168   ;;  %v1677_v42 = vshrl.u32 %v215_v40, 7 }
  0x3b   :  { %v1207_v10 = vpack.c.bf16 %v85_v9, %v84_v8  ;;  %v87_v12 = vld [vmem:[%s1991_s3 + $0x38] sm:$0xff]  ;;  %v88_v14 = vld [vmem:[%s1991_s3 + $0x40] sm:$0xff]  ;;  %v89_v15 = vld [vmem:[%s1991_s3 + $0x48] sm:$0xff]  ;;  %v213_v39 = vunpack.c.l.s4 %v1498_v38  ;;  %vm391_vm3 = vcmask 1041409   ;;  %vm393_vm4 = vcmask 1042434   ;;  %s1500_s16 = smov 96  }
  0x3c   :  { %1202 = vmatpush3.bf16.msra.mxu0 %v1201_v5  ;;  %v1210_v13 = vpack.c.bf16 %v87_v12, %v86_v11  ;;  %v1213_v16 = vpack.c.bf16 %v89_v15, %v88_v14  ;;  %v90_v17 = vld [vmem:[%s1991_s3 + $0x50] sm:$0xff]  ;;  %v91_v18 = vld [vmem:[%s1991_s3 + $0x58] sm:$0xff]  ;;  %v79_v20 = vld [vmem:[%s1988_s0] sm:$0xff]  ;;  %s1496_s3 = smov 64   ;;  %v1686_v48 = vsub.s32 0, %v1677_v42  ;;  %vm395_vm5 = vcmask 1043459  }
  0x3d   :  { %1203 = vmatprep.subr.bf16.mxu0 %v1493_v0  ;;  %v1216_v19 = vpack.c.bf16 %v91_v18, %v90_v17  ;;  %v1104_v21 = vld [vmem:[%s1992_s4] ss:$0 sm:$0xff]  ;;  %v214_v41 = vunpack.c.0.s8 %v213_v39  ;;  %v1704_v6 = vld [vmem:[#allocation5] sm:$0xff]  ;;  %v1706_v8 = vld [vmem:[#allocation5 + $0x8] sm:$0xff]  ;;  %v358_v39 = vand.u32 127, %v215_v40  ;;  %vm397_vm6 = vcmask 1044484  }
  0x3e   :  { %v180_v26 = vld [vmem:[#allocation2] sm:$0xff]  ;;  %v1709_v11 = vld [vmem:[#allocation5 + $0x10] sm:$0xff]  ;;  %vm399_vm7 = vcmask 1045509   ;;  %vm401_vm8 = vcmask 1046534   ;;  %vm403_vm9 = vcmask 1047559   ;;  %vm406_vm10 = vcmask 64512  }
  0x3f   :  { %v217_v43 = vsub.s32 %v214_v41, %v1677_v42  ;;  %v1713_v15 = vld [vmem:[#allocation5 + $0x18] sm:$0xff]  ;;  %s1502_s2 = smov [#allocation12]  }
  0x40   :  { %1205 = vmatpush3.bf16.msra.mxu0 %v1204_v7 }
  0x41   :  { %1206 = vmatprep.subr.bf16.mxu0 %v1493_v0 }
  0x44   :  { %1208 = vmatpush3.bf16.msra.mxu0 %v1207_v10 }
  0x45   :  { %1209 = vmatprep.subr.bf16.mxu0 %v1493_v0 }
  0x48   :  { %1211 = vmatpush3.bf16.msra.mxu0 %v1210_v13 }
  0x49   :  { %1212 = vmatprep.subr.bf16.mxu0 %v1493_v0 }
  0x4c   :  { %1214 = vmatpush3.bf16.msra.mxu0 %v1213_v16 }
  0x4d   :  { %1215 = vmatprep.subr.bf16.mxu0 %v1493_v0 }
  0x50   :  { %1217 = vmatpush3.bf16.msra.mxu0 %v1216_v19  ;;  %v1717_v19 = vld [vmem:[#allocation5 + $0x20] sm:$0xff] }
  0x53   :  { %1165 = vmatmul.mubr.msk.f32.vlgmr.msra.gmra.mrb[0].mxu0 %vm99_vm1, %v79_v20 }
 0x126   :  { %v169_v22 = vpop.f32.mrb[0].mxu0 }
 0x127   :  { %v170_v23 = vadd.f32 %v1104_v21, %v169_v22  ;;  %v1166_v24 = vpop.f32.mrb[1].mxu0 }
 0x129   :  { %1256 = vtanh.f32 %v170_v23  ;;  %v1106_v27 = vmul.f32 -1.442695, %v170_v23  ;;  %v1721_v23 = vld [vmem:[#allocation5 + $0x28] sm:$0xff] }
 0x12b   :  { %1258 = vpow2.f32 %v1106_v27 }
 0x133   :  { %v1257_v25 = vpop.eup %1256 }
 0x134   :  { %187 = vrot.lane.b32.xlu0 %v1257_v25, %s1496_s3 }
 0x135   :  { %v1259_v28 = vpop.eup %1258 }
 0x136   :  { %v176_v29 = vadd.f32 1.0, %v1259_v28 }
 0x138   :  { %182 = vrot.lane.b32.xlu0 %v180_v26, %s1497_s26  ;;  %1260 = vrcp.f32 %v176_v29  ;;  %v1724_v26 = vld [vmem:[#allocation5 + $0x30] sm:$0xff] }
 0x142   :  { %v1261_v30 = vpop.eup %1260 }
 0x1a6   :  { %v188_v31 = vpop.permute.xlu0 %187 }
 0x1a7   :  { %v190_v32 = vmul.f32 %v1261_v30, %v188_v31  ;;  %v1729_v31 = vld [vmem:[#allocation5 + $0x38] sm:$0xff] }
 0x1a9   :  { %192 = vrot.lane.b32.xlu1 %v190_v32, %s1497_s26 }
 0x1aa   :  { %v183_v33 = vpop.permute.xlu0 %182 }
 0x1ab   :  { %v185_v34 = vmul.f32 %v1261_v30, %v183_v33 }
 0x21b   :  { %v193_v35 = vpop.permute.xlu1 %192 }
 0x21c   :  { %v1673_v36 = vadd.f32 %v193_v35, %v185_v34 }
 0x21e   :  { %1262 = vtanh.f32 %v1673_v36 }
 0x228   :  { %v1263_v37 = vpop.eup %1262 }
 0x229   :  { %198 = vrot.lane.b32.xlu1 %v1263_v37, %s1496_s3  ;;  %s1070_s3 = sshll.u32 %s1502_s2, 4  ;;  %s1071_s3 = int_to_ptr.vmem [resolvable:$true] %s1070_s3 }
 0x29b   :  { %v199_v44 = vpop.permute.xlu1 %198 }
 0x29c   :  { %v1680_v45 = vmul.f32 %v1261_v30, %v199_v44 }
 0x29e   :  { %v211_v46 = vcombine.high %v1680_v45, %v1680_v45  ;;  %v218_v47 = vrot.slane %v1680_v45, %v217_v43 }
 0x2a0   :  { %v225_v49 = vrot.slane %v211_v46, %v217_v43  ;;  %v226_v50 = vcombine.high %v218_v47, %v218_v47  ;;  %v234_v51 = vrot.slane %v218_v47, %v217_v43 }
 0x2a2   :  { %v263_v52 = vrot.slane %v234_v51, %v1686_v48  ;;  %v248_v53 = vrot.slane %v226_v50, %v217_v43  ;;  %v256_v54 = vcombine.high %v234_v51, %v234_v51  ;;  %v227_v57 = vcombine.high %v225_v49, %v225_v49 }
 0x2a3   :  { %v241_v59 = vrot.slane %v225_v49, %v217_v43 }
 0x2a4   :  { %292 = vrot.lane.b32.xlu0 %v263_v52, %s1497_s26  ;;  %v267_v55 = vrot.slane %v248_v53, %v1686_v48  ;;  %v258_v56 = vcombine.high %v248_v53, %v248_v53  ;;  %v271_v58 = vrot.slane %v256_v54, %v1686_v48  ;;  %v255_v61 = vrot.slane %v227_v57, %v217_v43 }
 0x2a5   :  { %v279_v62 = vrot.slane %v241_v59, %v1686_v48  ;;  %v257_v63 = vcombine.high %v241_v59, %v241_v59  ;;  %v1738_v43 = vsub.s32 %v358_v39, %v1677_v42 }
 0x2a6   :  { %294 = vrot.lane.b32.xlu1 %v267_v55, %s1497_s26  ;;  %v275_v60 = vrot.slane %v258_v56, %v1686_v48  ;;  %v283_v2 = vrot.slane %v255_v61, %v1686_v48  ;;  %v259_v3 = vcombine.high %v255_v61, %v255_v61 }
 0x2a7   :  { %v287_v4 = vrot.slane %v257_v63, %v1686_v48 }
 0x2a8   :  { %296 = vrot.lane.b32.xlu0 %v271_v58, %s1497_s26  ;;  %v291_v5 = vrot.slane %v259_v3, %v1686_v48 }
 0x2aa   :  { %298 = vrot.lane.b32.xlu1 %v275_v60, %s1497_s26 }
 0x2ac   :  { %300 = vrot.lane.b32.xlu0 %v279_v62, %s1497_s26 }
 0x2ae   :  { %302 = vrot.lane.b32.xlu1 %v283_v2, %s1497_s26 }
 0x2b0   :  { %304 = vrot.lane.b32.xlu0 %v287_v4, %s1497_s26 }
 0x2b2   :  { %306 = vrot.lane.b32.xlu1 %v291_v5, %s1497_s26 }
 0x316   :  { %v293_v7 = vpop.permute.xlu0 %292 }
 0x317   :  { %v316_v9 = vmul.f32 %v293_v7, %v1704_v6  ;;  %v1499_v7 = vmov 0  }
 0x318   :  { %v295_v10 = vpop.permute.xlu1 %294  ;;  %1255 = vset.pattern.permute.xlu1 %v1499_v7  ;;  %1254 = vset.pattern.permute.xlu0 %v1499_v7 }
 0x319   :  { %v317_v12 = vmul.f32 %v295_v10, %v1706_v8  ;;  %v325_v13 = vsel %vm324_vm2, %v316_v9, 0.0  ;;  %v417_v9 = vsub.s32 1, %v1677_v42  ;;  %v421_v10 = vsub.s32 2, %v1677_v42 }
 0x31a   :  { %v297_v14 = vpop.permute.xlu0 %296  ;;  %326 = vadd.xlane.f32.xlu0 %v325_v13 }
 0x31b   :  { %v318_v16 = vmul.f32 %v297_v14, %v1709_v11  ;;  %v328_v17 = vsel %vm324_vm2, %v317_v12, 0.0  ;;  %v425_v12 = vsub.s32 3, %v1677_v42 }
 0x31c   :  { %v299_v18 = vpop.permute.xlu1 %298  ;;  %329 = vadd.xlane.f32.xlu1 %v328_v17 }
 0x31d   :  { %v319_v20 = vmul.f32 %v299_v18, %v1713_v15  ;;  %v331_v21 = vsel %vm324_vm2, %v318_v16, 0.0 }
 0x31e   :  { %v301_v22 = vpop.permute.xlu0 %300  ;;  %332 = vadd.xlane.f32.xlu0 %v331_v21  ;;  %v429_v21 = vsub.s32 4, %v1677_v42 }
 0x31f   :  { %v320_v24 = vmul.f32 %v301_v22, %v1717_v19  ;;  %v334_v28 = vsel %vm324_vm2, %v319_v20, 0.0 }
 0x320   :  { %v303_v25 = vpop.permute.xlu1 %302 }
 0x321   :  { %v321_v27 = vmul.f32 %v303_v25, %v1721_v23  ;;  %v337_v29 = vsel %vm324_vm2, %v320_v24, 0.0 }
 0x322   :  { %335 = vadd.xlane.f32.xlu0 %v334_v28  ;;  %v305_v30 = vpop.permute.xlu0 %304  ;;  %338 = vadd.xlane.f32.xlu1 %v337_v29  ;;  %v433_v28 = vsub.s32 5, %v1677_v42 }
 0x323   :  { %v322_v32 = vmul.f32 %v305_v30, %v1724_v26  ;;  %v340_v35 = vsel %vm324_vm2, %v321_v27, 0.0 }
 0x324   :  { %v307_v33 = vpop.permute.xlu1 %306 }
 0x325   :  { %v323_v34 = vmul.f32 %v307_v33, %v1729_v31  ;;  %v343_v37 = vsel %vm324_vm2, %v322_v32, 0.0  ;;  %v437_v33 = vsub.s32 6, %v1677_v42 }
 0x326   :  { %341 = vadd.xlane.f32.xlu0 %v340_v35  ;;  %344 = vadd.xlane.f32.xlu1 %v343_v37 }
 0x327   :  { %v346_v38 = vsel %vm324_vm2, %v323_v34, 0.0 }
 0x32a   :  { %347 = vadd.xlane.f32.xlu0 %v346_v38  ;;  %v441_v38 = vsub.s32 7, %v1677_v42 }
 0x3a7   :  { %v327_v41 = vpop.xlane.xlu0 %326 }
 0x3a8   :  { %v362_v49 = vrot.slane %v327_v41, %v1738_v43 }
 0x3a9   :  { %v330_v44 = vpop.xlane.xlu1 %329 }
 0x3aa   :  { %v366_v46 = vrot.slane %v330_v44, %v1738_v43 }
 0x3ab   :  { %v333_v47 = vpop.xlane.xlu0 %332 }
 0x3ac   :  { %v370_v50 = vrot.slane %v333_v47, %v1738_v43  ;;  %v392_v51 = vsel %vm391_vm3, %v366_v46, %v362_v49 }
 0x3ae   :  { %v394_v54 = vsel %vm393_vm4, %v370_v50, %v392_v51 }
 0x3af   :  { %v336_v52 = vpop.xlane.xlu0 %335  ;;  %v339_v53 = vpop.xlane.xlu1 %338 }
 0x3b0   :  { %v374_v40 = vrot.slane %v336_v52, %v1738_v43  ;;  %v378_v55 = vrot.slane %v339_v53, %v1738_v43 }
 0x3b2   :  { %v396_v56 = vsel %vm395_vm5, %v374_v40, %v394_v54 }
 0x3b3   :  { %v342_v57 = vpop.xlane.xlu0 %341  ;;  %v345_v58 = vpop.xlane.xlu1 %344  ;;  %v398_v60 = vsel %vm397_vm6, %v378_v55, %v396_v56 }
 0x3b4   :  { %v382_v59 = vrot.slane %v342_v57, %v1738_v43  ;;  %v386_v61 = vrot.slane %v345_v58, %v1738_v43 }
 0x3b6   :  { %v400_v62 = vsel %vm399_vm7, %v382_v59, %v398_v60 }
 0x3b7   :  { %v348_v63 = vpop.xlane.xlu0 %347  ;;  %v402_v3 = vsel %vm401_vm8, %v386_v61, %v400_v62 }
 0x3b8   :  { %v390_v2 = vrot.slane %v348_v63, %v1738_v43 }
 0x3ba   :  { %v404_v4 = vsel %vm403_vm9, %v390_v2, %v402_v3 }
 0x3bb   :  { %v407_v5 = vsel %vm406_vm10, %v404_v4, -inf }
 0x3bc   :  { %408 = vmax.xlane.f32.xlu1 %v407_v5 }
 0x449   :  { %v409_v13 = vpop.xlane.xlu1 %408 }
 0x44a   :  { %v414_v14 = vrot.slane %v409_v13, %v1686_v48  ;;  %v418_v16 = vrot.slane %v409_v13, %v417_v9  ;;  %v422_v17 = vrot.slane %v409_v13, %v421_v10  ;;  %v426_v22 = vrot.slane %v409_v13, %v425_v12 }
 0x44b   :  { %v430_v29 = vrot.slane %v409_v13, %v429_v21  ;;  %v434_v34 = vrot.slane %v409_v13, %v433_v28  ;;  %v438_v39 = vrot.slane %v409_v13, %v437_v33  ;;  %v442_v49 = vrot.slane %v409_v13, %v441_v38 }
 0x44c   :  { %v451_v18 = vsub.f32 %v327_v41, %v414_v14  ;;  %v452_v20 = vsub.f32 %v330_v44, %v418_v16  ;;  %v453_v24 = vsub.f32 %v333_v47, %v422_v17  ;;  %v454_v30 = vsub.f32 %v336_v52, %v426_v22 }
 0x44d   :  { %v455_v35 = vsub.f32 %v339_v53, %v430_v29  ;;  %v456_v41 = vsub.f32 %v342_v57, %v434_v34  ;;  %v457_v50 = vsub.f32 %v345_v58, %v438_v39  ;;  %v458_v53 = vsub.f32 %v348_v63, %v442_v49 }
 0x44e   :  { %v459_v25 = vmul.f32 1.442695, %v451_v18  ;;  %v461_v27 = vmul.f32 1.442695, %v452_v20  ;;  %v463_v32 = vmul.f32 1.442695, %v453_v24 }
 0x44f   :  { %v465_v37 = vmul.f32 1.442695, %v454_v30  ;;  %v467_v44 = vmul.f32 1.442695, %v455_v35  ;;  %v469_v51 = vmul.f32 1.442695, %v456_v41 }
 0x450   :  { %1264 = vpow2.f32 %v459_v25  ;;  %v471_v40 = vmul.f32 1.442695, %v457_v50  ;;  %v473_v55 = vmul.f32 1.442695, %v458_v53 }
 0x451   :  { %1266 = vpow2.f32 %v461_v27 }
 0x452   :  { %1268 = vpow2.f32 %v463_v32 }
 0x453   :  { %1270 = vpow2.f32 %v465_v37 }
 0x454   :  { %1272 = vpow2.f32 %v467_v44 }
 0x455   :  { %1274 = vpow2.f32 %v469_v51 }
 0x456   :  { %1276 = vpow2.f32 %v471_v40 }
 0x457   :  { %1278 = vpow2.f32 %v473_v55 }
 0x45a   :  { %v1265_v46 = vpop.eup %1264 }
 0x45b   :  { %v1776_v47 = vpop.eup %1266  ;;  %484 = vperm.xlu0 %1254, %v1265_v46  }
 0x45c   :  { %487 = vperm.xlu1 %1255, %v1776_v47   ;;  %v1781_v52 = vpop.eup %1268 }
 0x45d   :  { %v1784_v54 = vpop.eup %1270 }
 0x45e   :  { %v1787_v56 = vpop.eup %1272 }
 0x45f   :  { %v1790_v57 = vpop.eup %1274 }
 0x460   :  { %490 = vperm.xlu1 %1255, %v1781_v52   ;;  %v1793_v58 = vpop.eup %1276 }
 0x461   :  { %v1796_v59 = vpop.eup %1278 }
 0x464   :  { %493 = vperm.xlu1 %1255, %v1784_v54  }
 0x468   :  { %496 = vperm.xlu1 %1255, %v1787_v56  }
 0x46c   :  { %499 = vperm.xlu1 %1255, %v1790_v57  }
 0x470   :  { %502 = vperm.xlu1 %1255, %v1793_v58  }
 0x474   :  { %505 = vperm.xlu1 %1255, %v1796_v59  }
 0x4da   :  { %v485_v2 = vpop.permute.xlu0 %484 }
 0x4db   :  { %v488_v60 = vpop.permute.xlu1 %487  ;;  %v510_v5 = vrot.slane %v485_v2, %v1738_v43 }
 0x4dc   :  { %v514_v4 = vrot.slane %v488_v60, %v1738_v43 }
 0x4de   :  { %v539_v17 = vsel %vm391_vm3, %v514_v4, %v510_v5 }
 0x4df   :  { %v491_v61 = vpop.permute.xlu1 %490 }
 0x4e0   :  { %v518_v7 = vrot.slane %v491_v61, %v1738_v43 }
 0x4e2   :  { %v540_v20 = vsel %vm393_vm4, %v518_v7, %v539_v17 }
 0x4e3   :  { %v494_v62 = vpop.permute.xlu1 %493 }
 0x4e4   :  { %v522_v13 = vrot.slane %v494_v62, %v1738_v43 }
 0x4e6   :  { %v541_v24 = vsel %vm395_vm5, %v522_v13, %v540_v20 }
 0x4e7   :  { %v497_v63 = vpop.permute.xlu1 %496 }
 0x4e8   :  { %v526_v14 = vrot.slane %v497_v63, %v1738_v43 }
 0x4ea   :  { %v542_v25 = vsel %vm397_vm6, %v526_v14, %v541_v24 }
 0x4eb   :  { %v500_v3 = vpop.permute.xlu1 %499 }
 0x4ec   :  { %v530_v18 = vrot.slane %v500_v3, %v1738_v43 }
 0x4ee   :  { %v543_v29 = vsel %vm399_vm7, %v530_v18, %v542_v25 }
 0x4ef   :  { %v503_v16 = vpop.permute.xlu1 %502 }
 0x4f0   :  { %v534_v22 = vrot.slane %v503_v16, %v1738_v43 }
 0x4f2   :  { %v544_v32 = vsel %vm401_vm8, %v534_v22, %v543_v29 }
 0x4f3   :  { %v506_v27 = vpop.permute.xlu1 %505 }
 0x4f4   :  { %v538_v30 = vrot.slane %v506_v27, %v1738_v43 }
 0x4f6   :  { %v545_v34 = vsel %vm403_vm9, %v538_v30, %v544_v32 }
 0x4f7   :  { %v547_v35 = vsel %vm406_vm10, %v545_v34, 0.0 }
 0x4f8   :  { %548 = vadd.xlane.f32.xlu1 %v547_v35 }
 0x585   :  { %v549_v37 = vpop.xlane.xlu1 %548 }
 0x586   :  { %v554_v39 = vrot.slane %v549_v37, %v1686_v48  ;;  %v558_v41 = vrot.slane %v549_v37, %v417_v9  ;;  %v562_v44 = vrot.slane %v549_v37, %v421_v10  ;;  %v566_v49 = vrot.slane %v549_v37, %v425_v12 }
 0x587   :  { %v570_v51 = vrot.slane %v549_v37, %v429_v21  ;;  %v574_v48 = vrot.slane %v549_v37, %v433_v28  ;;  %v578_v10 = vrot.slane %v549_v37, %v437_v33  ;;  %v582_v21 = vrot.slane %v549_v37, %v441_v38  ;;  %v715_v38 = vld [vmem:[%s1993_s5 + $0x20] sm:$0xff] }
 0x588   :  { %1280 = vrcp.f32 %v554_v39 }
 0x589   :  { %1282 = vrcp.f32 %v558_v41 }
 0x58a   :  { %1284 = vrcp.f32 %v562_v44 }
 0x58b   :  { %1286 = vrcp.f32 %v566_v49 }
 0x58c   :  { %1288 = vrcp.f32 %v570_v51 }
 0x58d   :  { %1290 = vrcp.f32 %v574_v48 }
 0x58e   :  { %1292 = vrcp.f32 %v578_v10 }
 0x58f   :  { %1294 = vrcp.f32 %v582_v21 }
 0x592   :  { %v1281_v50 = vpop.eup %1280 }
 0x593   :  { %v592_v53 = vmul.f32 %v1281_v50, %v1265_v46  ;;  %v1283_v40 = vpop.eup %1282 }
 0x594   :  { %v594_v9 = vmul.f32 %v1283_v40, %v1776_v47  ;;  %v1285_v55 = vpop.eup %1284 }
 0x595   :  { %609 = vperm.xlu0 %1254, %v592_v53   ;;  %v596_v12 = vmul.f32 %v1285_v55, %v1781_v52  ;;  %v1287_v60 = vpop.eup %1286 }
 0x596   :  { %v598_v46 = vmul.f32 %v1287_v60, %v1784_v54  ;;  %v1289_v61 = vpop.eup %1288  ;;  %v716_v54 = vld [vmem:[%s1993_s5 + $0x28] sm:$0xff] }
 0x597   :  { %v600_v28 = vmul.f32 %v1289_v61, %v1787_v56  ;;  %v1291_v47 = vpop.eup %1290  ;;  %v717_v56 = vld [vmem:[%s1993_s5 + $0x30] sm:$0xff] }
 0x598   :  { %v602_v62 = vmul.f32 %v1291_v47, %v1790_v57  ;;  %v1293_v33 = vpop.eup %1292  ;;  %v1219_v57 = vpack.c.bf16 %v716_v54, %v715_v38 }
 0x599   :  { %614 = vperm.xlu0 %1254, %v594_v9   ;;  %v604_v52 = vmul.f32 %v1293_v33, %v1793_v58  ;;  %v1295_v63 = vpop.eup %1294  ;;  %v718_v58 = vld [vmem:[%s1993_s5 + $0x38] sm:$0xff] }
 0x59a   :  { %v606_v42 = vmul.f32 %v1295_v63, %v1796_v59  ;;  %1220 = vmatpush3.bf16.msra.mxu1 %v1219_v57  ;;  %v1222_v59 = vpack.c.bf16 %v718_v58, %v717_v56 }
 0x59b   :  { %1221 = vmatprep.subr.bf16.mxu1 %v1493_v0 }
 0x59d   :  { %619 = vperm.xlu0 %1254, %v596_v12  }
 0x59e   :  { %1223 = vmatpush3.bf16.msra.mxu1 %v1222_v59 }
 0x59f   :  { %1224 = vmatprep.subr.bf16.mxu1 %v1493_v0 }
 0x5a1   :  { %624 = vperm.xlu0 %1254, %v598_v46  }
 0x5a5   :  { %629 = vperm.xlu0 %1254, %v600_v28  }
 0x5a9   :  { %634 = vperm.xlu0 %1254, %v602_v62  }
 0x5ad   :  { %639 = vperm.xlu0 %1254, %v604_v52  }
 0x5b1   :  { %644 = vperm.xlu0 %1254, %v606_v42  }
 0x5b5   :  { %806 = vrot.lane.b32.xlu0 %v1680_v45, %s1497_s26 }
 0x614   :  { %v610_v45 = vpop.permute.xlu0 %609 }
 0x615   :  { %v647_v4 = vmul.f32 %v610_v45, %v1704_v6  ;;  %v996_v41 = vrot.slane %v610_v45, %v1738_v43 }
 0x617   :  { %v655_v14 = vsel %vm324_vm2, %v647_v4, 0.0 }
 0x618   :  { %v615_v2 = vpop.permute.xlu0 %614  ;;  %v656_v22 = vrot.slane %v655_v14, 4 }
 0x619   :  { %v648_v3 = vmul.f32 %v615_v2, %v1706_v8  ;;  %v1000_v39 = vrot.slane %v615_v2, %v1738_v43 }
 0x61b   :  { %v662_v13 = vsel %vm324_vm2, %v648_v3, 0.0  ;;  %v1025_v12 = vsel %vm391_vm3, %v1000_v39, %v996_v41  ;;  %v711_v41 = vld [vmem:[%s1993_s5] sm:$0xff] }
 0x61c   :  { %v620_v5 = vpop.permute.xlu0 %619  ;;  %v663_v20 = vrot.slane %v662_v13, 4 }
 0x61d   :  { %v649_v7 = vmul.f32 %v620_v5, %v1709_v11  ;;  %v657_v11 = vadd.f32 %v656_v22, %v655_v14  ;;  %v1004_v49 = vrot.slane %v620_v5, %v1738_v43 }
 0x61e   :  { %v664_v29 = vadd.f32 %v663_v20, %v662_v13 }
 0x61f   :  { %v669_v16 = vsel %vm324_vm2, %v649_v7, 0.0  ;;  %v658_v51 = vrot.slane %v657_v11, 2  ;;  %v1026_v61 = vsel %vm393_vm4, %v1004_v49, %v1025_v12 }
 0x620   :  { %v625_v17 = vpop.permute.xlu0 %624  ;;  %v670_v24 = vrot.slane %v669_v16, 4  ;;  %v665_v44 = vrot.slane %v664_v29, 2 }
 0x621   :  { %v650_v18 = vmul.f32 %v625_v17, %v1713_v15  ;;  %v1008_v53 = vrot.slane %v625_v17, %v1738_v43  ;;  %v659_v62 = vadd.f32 %v658_v51, %v657_v11 }
 0x622   :  { %v671_v30 = vadd.f32 %v670_v24, %v669_v16  ;;  %v666_v46 = vadd.f32 %v665_v44, %v664_v29  ;;  %v712_v44 = vld [vmem:[%s1993_s5 + $0x8] sm:$0xff] }
 0x623   :  { %v676_v25 = vsel %vm324_vm2, %v650_v18, 0.0  ;;  %v1027_v52 = vsel %vm395_vm5, %v1008_v53, %v1026_v61  ;;  %v660_v16 = vrot.slane %v659_v62, 1  ;;  %v892_v61 = vld [vmem:[#allocation7 + $0x18] sm:$0xff] }
 0x624   :  { %v677_v8 = vrot.slane %v676_v25, 4  ;;  %v630_v27 = vpop.permute.xlu0 %629  ;;  %v667_v2 = vrot.slane %v666_v46, 1 }
 0x625   :  { %v651_v6 = vmul.f32 %v630_v27, %v1717_v19  ;;  %v672_v19 = vrot.slane %v671_v30, 2  ;;  %v1012_v9 = vrot.slane %v630_v27, %v1738_v43 }
 0x626   :  { %v678_v34 = vadd.f32 %v677_v8, %v676_v25 }
 0x627   :  { %v683_v32 = vsel %vm324_vm2, %v651_v6, 0.0  ;;  %v673_v33 = vadd.f32 %v672_v19, %v671_v30  ;;  %v1028_v38 = vsel %vm397_vm6, %v1012_v9, %v1027_v52  ;;  %v661_v6 = vadd.f32 %v660_v16, %v659_v62  ;;  %v713_v9 = vld [vmem:[%s1993_s5 + $0x10] sm:$0xff]  ;;  %v1109_v52 = vld [vmem:[%s1994_s6] ss:$0 sm:$0xff]  ;;  %s1501_s6 = smov [#allocation9]  }
 0x628   :  { %v684_v35 = vrot.slane %v683_v32, 4  ;;  %v635_v37 = vpop.permute.xlu0 %634  ;;  %v679_v48 = vrot.slane %v678_v34, 2 }
 0x629   :  { %v652_v15 = vmul.f32 %v635_v37, %v1721_v23  ;;  %v1016_v60 = vrot.slane %v635_v37, %v1738_v43  ;;  %v674_v7 = vrot.slane %v673_v33, 1 }
 0x62a   :  { %v685_v50 = vadd.f32 %v684_v35, %v683_v32  ;;  %v680_v42 = vadd.f32 %v679_v48, %v678_v34 }
 0x62b   :  { %v690_v40 = vsel %vm324_vm2, %v652_v15, 0.0  ;;  %v675_v27 = vadd.f32 %v674_v7, %v673_v33 }
 0x62c   :  { %v691_v55 = vrot.slane %v690_v40, 4  ;;  %v640_v10 = vpop.permute.xlu0 %639  ;;  %v686_v23 = vrot.slane %v685_v50, 2  ;;  %v681_v17 = vrot.slane %v680_v42, 1 }
 0x62d   :  { %v653_v21 = vmul.f32 %v640_v10, %v1724_v26  ;;  %v1020_v47 = vrot.slane %v640_v10, %v1738_v43  ;;  %v1029_v26 = vsel %vm399_vm7, %v1016_v60, %v1028_v38  ;;  %v890_v60 = vld [vmem:[#allocation7 + $0x8] sm:$0xff] }
 0x62e   :  { %v692_v28 = vadd.f32 %v691_v55, %v690_v40  ;;  %v687_v58 = vadd.f32 %v686_v23, %v685_v50  ;;  %v682_v29 = vadd.f32 %v681_v17, %v680_v42  ;;  %v1225_v40 = vpack.c.bf16 %v712_v44, %v711_v41  ;;  %v714_v55 = vld [vmem:[%s1993_s5 + $0x18] sm:$0xff]  ;;  %v889_v23 = vld [vmem:[#allocation7] sm:$0xff] }
 0x62f   :  { %v697_v63 = vsel %vm324_vm2, %v653_v21, 0.0  ;;  %v1030_v5 = vsel %vm401_vm8, %v1020_v47, %v1029_v26  ;;  %v1228_v12 = vpack.c.bf16 %v714_v55, %v713_v9  ;;  %v891_v21 = vld [vmem:[#allocation7 + $0x10] sm:$0xff] }
 0x630   :  { %v693_v54 = vrot.slane %v692_v28, 2  ;;  %v698_v56 = vrot.slane %v697_v63, 4  ;;  %v645_v57 = vpop.permute.xlu0 %644 }
 0x631   :  { %v654_v59 = vmul.f32 %v645_v57, %v1729_v31  ;;  %v1024_v45 = vrot.slane %v645_v57, %v1738_v43  ;;  %v688_v31 = vrot.slane %v687_v58, 1  ;;  %v668_v43 = vadd.f32 %v667_v2, %v666_v46 }
 0x632   :  { %v694_v3 = vadd.f32 %v693_v54, %v692_v28  ;;  %v699_v4 = vadd.f32 %v698_v56, %v697_v63  ;;  %v1231_v46 = vpack.c.bf16 %v890_v60, %v889_v23  ;;  %v1234_v28 = vpack.c.bf16 %v892_v61, %v891_v21  ;;  %v1110_v54 = vld [vmem:[%s1996_s8] ss:$0 sm:$0xff]  ;;  %s1050_s8 = sshll.u32 %s1501_s6, 4  ;;  %s1051_s8 = int_to_ptr.vmem [resolvable:$true] %s1050_s8 }
 0x633   :  { %v704_v13 = vsel %vm324_vm2, %v654_v59, 0.0  ;;  %v1031_v14 = vsel %vm403_vm9, %v1024_v45, %v1030_v5  ;;  %v689_v32 = vadd.f32 %v688_v31, %v687_v58  ;;  %v727_v34 = vsel %vm391_vm3, %v668_v43, %v661_v6  ;;  %s1368_s26 = scalar_lea.vmem %s1051_s8, 128  ;;  %p1373_p11 = scmp.lt.s32.totalorder %s1051_s8, %s1051_s8 }
 0x634   :  { %v700_v18 = vrot.slane %v699_v4, 2  ;;  %v705_v20 = vrot.slane %v704_v13, 4  ;;  %v807_v22 = vpop.permute.xlu0 %806  ;;  %1033 = vst.msk [vmem:[#allocation14] sm:$0xff] %vm406_vm10, %v1031_v14  ;;  %v695_v24 = vrot.slane %v694_v3, 1  ;;  %v728_v39 = vsel %vm393_vm4, %v675_v27, %v727_v34  ;;  %p1369_p10 = scmp.ne.s32.totalorder %s1051_s8, %s1368_s26  ;;  %p1374_p12 = scmp.lt.s32.totalorder %s1368_s26, %s1368_s26 }
 0x635   :  { %987 = vst.msk [vmem:[#allocation11] sm:$0xff] %vm324_vm2, %v807_v22  ;;  %v729_v50 = vsel %vm395_vm5, %v682_v29, %v728_v39 }
 0x636   :  { %v701_v25 = vadd.f32 %v700_v18, %v699_v4  ;;  %v706_v8 = vadd.f32 %v705_v20, %v704_v13  ;;  %v696_v35 = vadd.f32 %v695_v24, %v694_v3  ;;  %v730_v51 = vsel %vm397_vm6, %v689_v32, %v729_v50  ;;  %p1375_p13 = por %p1374_p12, %p1373_p11 }
 0x638   :  { %v702_v11 = vrot.slane %v701_v25, 1  ;;  %v707_v30 = vrot.slane %v706_v8, 2  ;;  %v731_v53 = vsel %vm399_vm7, %v696_v35, %v730_v51  ;;  %p1376_p0 = pnand %p1375_p13, %p1369_p10 }
 0x63a   :  { %v708_v37 = vadd.f32 %v707_v30, %v706_v8  ;;  %v703_v15 = vadd.f32 %v702_v11, %v701_v25 }
 0x63c   :  { %v709_v49 = vrot.slane %v708_v37, 1  ;;  %v732_v48 = vsel %vm401_vm8, %v703_v15, %v731_v53 }
 0x63e   :  { %v710_v19 = vadd.f32 %v709_v49, %v708_v37 }
 0x640   :  { %v733_v10 = vsel %vm403_vm9, %v710_v19, %v732_v48 }
 0x641   :  { %1176 = vmatmul.mubr.msk.f32.vlgmr.msra.gmra.mrb[0].mxu1 %vm324_vm2, %v733_v10  ;;  %985 = vst.msk [vmem:[#allocation9] sm:$0xff] %vm324_vm2, %v733_v10 }
 0x642   :  { %1226 = vmatpush3.bf16.msra.mxu1 %v1225_v40  ;;  %1186 = vmatprep.mubr.msk.f32.mxu1 %vm1494_vm0, %v1495_v1 }
 0x643   :  { %1227 = vmatprep.subr.bf16.mxu1 %v1493_v0 }
 0x646   :  { %1229 = vmatpush3.bf16.msra.mxu1 %v1228_v12 }
 0x647   :  { %1230 = vmatprep.subr.bf16.mxu1 %v1493_v0 }
 0x649   :  { %1187 = vmatmul.mubr.msk.f32.vlgmr.msra.gmra.mrb[2].mxu1 %vm324_vm2, %v807_v22 }
 0x64a   :  { %1197 = vmatprep.mubr.msk.f32.mxu1 %vm1494_vm0, %v1495_v1  ;;  %1232 = vmatpush3.bf16.msra.mxu1 %v1231_v46 }
 0x64b   :  { %1233 = vmatprep.subr.bf16.mxu1 %v1493_v0 }
 0x64e   :  { %1235 = vmatpush3.bf16.msra.mxu1 %v1234_v28 }
 0x714   :  { %v802_v47 = vpop.f32.mrb[0].mxu1 }
 0x715   :  { %v1177_v62 = vpop.f32.mrb[1].mxu1 }
 0x71c   :  { %v876_v33 = vpop.f32.mrb[2].mxu1 }
 0x71d   :  { %v877_v63 = vadd.f32 %v876_v33, %v802_v47  ;;  %v1188_v42 = vpop.f32.mrb[3].mxu1 }
 0x71f   :  { %v887_v1 = vadd.f32 %v1109_v52, %v877_v63 }
 0x721   :  { %1296 = vtanh.f32 %v887_v1 }
 0x72b   :  { %v1297_v38 = vpop.eup %1296 }
 0x72c   :  { %1198 = vmatmul.mubr.msk.f32.vlgmr.msra.gmra.mrb[4].mxu1 %vm324_vm2, %v1297_v38 }
 0x7ff   :  { %v969_v0 = vpop.f32.mrb[4].mxu1 }
 0x800   :  { %v970_v56 = vadd.f32 %v1110_v54, %v969_v0  ;;  %v1199_v57 = vpop.f32.mrb[5].mxu1 }
 0x802   :  { %973 = vmax.xlane.f32.xlu1 %v970_v56 }
 0x813   :  { %989 = vrot.lane.b32.xlu1 %v1673_v36, %s1500_s16 }
 0x88f   :  { %v974_v58 = vpop.xlane.xlu1 %973 }
 0x890   :  { %v1923_v26 = vsub.f32 %v970_v56, %v974_v58 }
 0x892   :  { %v976_v59 = vmul.f32 1.442695, %v1923_v26 }
 0x893   :  { %v990_v45 = vpop.permute.xlu1 %989 }
 0x894   :  { %1298 = vpow2.f32 %v976_v59  ;;  %992 = vst.msk [vmem:[#allocation12] sm:$0xff] %vm324_vm2, %v990_v45 }
 0x89e   :  { %v1299_v2 = vpop.eup %1298 }
 0x89f   :  { %978 = vadd.xlane.f32.xlu0 %v1299_v2 }
 0x8a0   :  { %1379 = shalt.err (!%p1376_p0)
}
 0x8a1   :  { %s1380_s17 = scalar_lea.hbm %s1998_s10, 128 }
 0x8a2   :  { %p1381_p1 = scmp.ne.s32.totalorder %s1998_s10, %s1380_s17  ;;  %p1384_p2 = scmp.lt.u32.totalorder %s1380_s17, %s1998_s10 }
 0x8a4   :  { %p1386_p3 = pnand %p1384_p2, %p1381_p1 }
 0x8a6   :  { %1389 = shalt.err (!%p1386_p3)
}
 0x8a7   :  { %1053 = dma.vmem_to_hbm [thread:$0]  %s1051_s8, 128, %s1998_s10, [#allocation10]  }
 0x8a8   :  { %s1390_s29 = scalar_lea.vmem %s1071_s3, 128  ;;  %p1395_p5 = scmp.lt.s32.totalorder %s1071_s3, %s1071_s3 }
 0x8a9   :  { %p1391_p4 = scmp.ne.s32.totalorder %s1071_s3, %s1390_s29  ;;  %p1396_p6 = scmp.lt.s32.totalorder %s1390_s29, %s1390_s29 }
 0x8ab   :  { %p1397_p7 = por %p1396_p6, %p1395_p5 }
 0x8ad   :  { %p1398_p8 = pnand %p1397_p7, %p1391_p4 }
 0x8af   :  { %1401 = shalt.err (!%p1398_p8)
}
 0x8b0   :  { %s1402_s23 = scalar_lea.hbm %s2000_s12, 128 }
 0x8b1   :  { %p1403_p9 = scmp.ne.s32.totalorder %s2000_s12, %s1402_s23  ;;  %p1406_p10 = scmp.lt.u32.totalorder %s1402_s23, %s2000_s12 }
 0x8b3   :  { %p1408_p11 = pnand %p1406_p10, %p1403_p9 }
 0x8b5   :  { %1411 = shalt.err (!%p1408_p11)
}
 0x8b6   :  { %1073 = dma.vmem_to_hbm [thread:$0]  %s1071_s3, 128, %s2000_s12, [#allocation13]  }
 0x8b7   :  { %s1503_s19 = smov [#allocation11]  }
 0x8b8   :  { %s1060_s25 = sshll.u32 %s1503_s19, 4  ;;  %s1061_s25 = int_to_ptr.vmem [resolvable:$true] %s1060_s25 }
 0x8b9   :  { %s1412_s16 = scalar_lea.vmem %s1061_s25, 128  ;;  %p1417_p13 = scmp.lt.s32.totalorder %s1061_s25, %s1061_s25 }
 0x8ba   :  { %p1413_p12 = scmp.ne.s32.totalorder %s1061_s25, %s1412_s16  ;;  %p1418_p0 = scmp.lt.s32.totalorder %s1412_s16, %s1412_s16 }
 0x8bc   :  { %p1419_p1 = por %p1418_p0, %p1417_p13 }
 0x8be   :  { %p1420_p2 = pnand %p1419_p1, %p1413_p12 }
 0x8c0   :  { %1423 = shalt.err (!%p1420_p2)
}
 0x8c1   :  { %s1424_s2 = scalar_lea.hbm %s1999_s11, 128 }
 0x8c2   :  { %p1425_p3 = scmp.ne.s32.totalorder %s1999_s11, %s1424_s2  ;;  %p1428_p4 = scmp.lt.u32.totalorder %s1424_s2, %s1999_s11 }
 0x8c4   :  { %p1430_p5 = pnand %p1428_p4, %p1425_p3 }
 0x8c6   :  { %1433 = shalt.err (!%p1430_p5)
}
 0x8c7   :  { %1063 = dma.vmem_to_hbm [thread:$0]  %s1061_s25, 128, %s1999_s11, [#allocation10]  }
 0x8c8   :  { %s1504_s20 = smov [#allocation14]  }
 0x8c9   :  { %s1080_s21 = sshll.u32 %s1504_s20, 4  ;;  %s1081_s21 = int_to_ptr.vmem [resolvable:$true] %s1080_s21 }
 0x8ca   :  { %s1434_s22 = scalar_lea.vmem %s1081_s21, 128  ;;  %p1439_p7 = scmp.lt.s32.totalorder %s1081_s21, %s1081_s21 }
 0x8cb   :  { %p1435_p6 = scmp.ne.s32.totalorder %s1081_s21, %s1434_s22  ;;  %p1440_p8 = scmp.lt.s32.totalorder %s1434_s22, %s1434_s22 }
 0x8cd   :  { %p1441_p9 = por %p1440_p8, %p1439_p7 }
 0x8cf   :  { %p1442_p10 = pnand %p1441_p9, %p1435_p6 }
 0x8d1   :  { %1445 = shalt.err (!%p1442_p10)
}
 0x8d2   :  { %s1446_s28 = scalar_lea.hbm %s2001_s13, 128 }
 0x8d3   :  { %p1447_p11 = scmp.ne.s32.totalorder %s2001_s13, %s1446_s28  ;;  %p1450_p12 = scmp.lt.u32.totalorder %s1446_s28, %s2001_s13 }
 0x8d5   :  { %p1452_p13 = pnand %p1450_p12, %p1447_p11 }
 0x8d7   :  { %1455 = shalt.err (!%p1452_p13)
}
 0x8d8   :  { %1083 = dma.vmem_to_hbm [thread:$0]  %s1081_s21, 128, %s2001_s13, [#allocation13]  }
 0x8d9   :  { %s1505_s15 = smov [#allocation8]  }
 0x8da   :  { %s1040_s7 = sshll.u32 %s1505_s15, 4  ;;  %s1041_s7 = int_to_ptr.vmem [resolvable:$true] %s1040_s7 }
 0x8db   :  { %s1456_s5 = scalar_lea.vmem %s1041_s7, 128  ;;  %p1461_p1 = scmp.lt.s32.totalorder %s1041_s7, %s1041_s7 }
 0x8dc   :  { %p1457_p0 = scmp.ne.s32.totalorder %s1041_s7, %s1456_s5  ;;  %p1462_p2 = scmp.lt.s32.totalorder %s1456_s5, %s1456_s5 }
 0x8de   :  { %p1463_p3 = por %p1462_p2, %p1461_p1 }
 0x8e0   :  { %p1464_p4 = pnand %p1463_p3, %p1457_p0 }
 0x92c   :  { %v979_v36 = vpop.xlane.xlu0 %978 }
 0x92d   :  { %1300 = vlog2.f32 %v979_v36 }
 0x937   :  { %v1301_v3 = vpop.eup %1300 }
 0x938   :  { %v981_v4 = vmul.f32 0.6931472, %v1301_v3 }
 0x93a   :  { %v982_v5 = vsub.f32 %v1923_v26, %v981_v4 }
 0x93c   :  { %983 = vst [vmem:[#allocation8] sm:$0xff] %v982_v5 }
 0x93d   :  { %1467 = shalt.err (!%p1464_p4)
}
 0x93e   :  { %s1468_s13 = scalar_lea.hbm %s1997_s9, 128 }
 0x93f   :  { %p1469_p5 = scmp.ne.s32.totalorder %s1997_s9, %s1468_s13  ;;  %p1472_p6 = scmp.lt.u32.totalorder %s1468_s13, %s1997_s9 }
 0x941   :  { %p1474_p7 = pnand %p1472_p6, %p1469_p5 }
 0x943   :  { %1477 = shalt.err (!%p1474_p7)
}
 0x944   :  { %1043 = dma.vmem_to_hbm [thread:$0]  %s1041_s7, 128, %s1997_s9, [#allocation4]  }
 0x945   :  { %1482 = dma.done.wait [#allocation4], 128  }
 0x946   :  { %1483 = vsyncadd [#allocation4], 4294967168 }
 0x947   :  { %1484 = dma.done.wait [#allocation10], 256  }
 0x948   :  { %1485 = vsyncadd [#allocation10], 4294967040 }
 0x949   :  { %1486 = dma.done.wait [#allocation13], 256  }
 0x94a   :  { %1487 = vsyncadd [#allocation13], 4294967040 }
 0x94b   :  { %1099 = vsyncpa [#allocation3], 1 }
 0x94c   :  { %1100 = vsyncpa [#allocation6], 1 }
 0x94d   :  { %1101 = vsyncpa [#allocation4], 1 }
 0x94e   :  { %1102 = vsyncpa [#allocation10], 1 }
 0x94f   :  { %1103 = vsyncpa [#allocation13], 1 }

</bundles_post_ra>
